<compile_context>
chip_gen: v7x
topology: tpu7x:2x2x1
jax: 0.10.0
libtpu: 0.0.40
codegen_flags: <defaults>
</compile_context>

<pallas_src>
import functools

import jax
import jax.numpy as jnp
from jax.experimental import pallas as pl
from jax.experimental.pallas import tpu as pltpu

LANE = 128


def _round_up(v, m):
    return ((v + m - 1) // m) * m


def _pick_tile(n_pad):
    # Largest tile that divides n_pad; 512^2 bf16 double-buffered (~1 MiB) fits the
    # default scoped VMEM on all chips (v5e 16 MiB, v6e 32 MiB, v7x 64 MiB physical).
    for t in (512, 256, 128):
        if n_pad % t == 0:
            return t
    return n_pad


# --------------------------------------------------------------------------- kernels

def sage_layer_kernel(a_ref, hk_ref, hi_ref, w_ref, b_ref, out_ref, acc_ref,
                      *, apply_relu):
    """One SAGEConv layer, tiled over (node-row tile i, aggregation tile k)."""
    k = pl.program_id(1)

    @pl.when(k == 0)
    def _():
        acc_ref[...] = jnp.zeros_like(acc_ref)

    # neighbor-mean aggregation: acc += A[i, k] @ H[k, :]
    acc_ref[...] += jnp.dot(a_ref[...], hk_ref[...],
                            preferred_element_type=jnp.float32)

    @pl.when(k == pl.num_programs(1) - 1)
    def _():
        # fused projection (single MXU contraction): [agg | self] @ [Wl ; Wr] + b
        feat = jnp.concatenate(
            [acc_ref[...].astype(jnp.bfloat16), hi_ref[...]], axis=-1)
        y = jnp.dot(feat, w_ref[...], preferred_element_type=jnp.float32) + b_ref[...]
        if apply_relu:
            y = jnp.maximum(y, 0.0)
        out_ref[...] = y.astype(out_ref.dtype)


def pooled_sage_kernel(pa_ref, p_ref, h_ref, w_ref, b_ref, out_ref,
                       agg_ref, slf_ref):
    """Final SAGEConv layer fused with global_mean_pool (pooling folded via P@A)."""
    k = pl.program_id(0)

    @pl.when(k == 0)
    def _():
        agg_ref[...] = jnp.zeros_like(agg_ref)
        slf_ref[...] = jnp.zeros_like(slf_ref)

    h = h_ref[...]
    agg_ref[...] += jnp.dot(pa_ref[...], h, preferred_element_type=jnp.float32)
    slf_ref[...] += jnp.dot(p_ref[...], h, preferred_element_type=jnp.float32)

    @pl.when(k == pl.num_programs(0) - 1)
    def _():
        feat = jnp.concatenate([agg_ref[...], slf_ref[...]], axis=-1).astype(jnp.bfloat16)
        out_ref[...] = (jnp.dot(feat, w_ref[...], preferred_element_type=jnp.float32)
                        + b_ref[...])


# --------------------------------------------------------------------------- wrappers

def _sage_layer(adj, h, w_cat, bias, *, apply_relu, tm, tk):
    n_pad = adj.shape[0]
    c_in = h.shape[1]
    c_out = w_cat.shape[1]
    return pl.pallas_call(
        functools.partial(sage_layer_kernel, apply_relu=apply_relu),
        out_shape=jax.ShapeDtypeStruct((n_pad, c_out), jnp.bfloat16),
        grid_spec=pltpu.PrefetchScalarGridSpec(
            num_scalar_prefetch=0,
            grid=(n_pad // tm, n_pad // tk),
            in_specs=[
                pl.BlockSpec((tm, tk), lambda i, k: (i, k)),           # A tile (streamed)
                pl.BlockSpec((tk, c_in), lambda i, k: (k, 0)),         # H rows for aggregation
                pl.BlockSpec((tm, c_in), lambda i, k: (i, 0)),         # H rows for self term
                pl.BlockSpec((2 * c_in, c_out), lambda i, k: (0, 0)),  # [Wl ; Wr]
                pl.BlockSpec((1, c_out), lambda i, k: (0, 0)),         # bias
            ],
            out_specs=pl.BlockSpec((tm, c_out), lambda i, k: (i, 0)),
            scratch_shapes=[pltpu.VMEM((tm, c_in), jnp.float32)],
        ),
        compiler_params=pltpu.CompilerParams(
            dimension_semantics=("parallel", "arbitrary"),
            vmem_limit_bytes=32 * 1024 * 1024,
        ),
    )(adj, h, h, w_cat, bias)


def _pooled_sage_layer(pa, p, h, w_cat, bias, *, tk):
    n_pad, c_in = h.shape
    b_pad = pa.shape[0]
    c_out = w_cat.shape[1]
    return pl.pallas_call(
        pooled_sage_kernel,
        out_shape=jax.ShapeDtypeStruct((b_pad, c_out), jnp.float32),
        grid_spec=pltpu.PrefetchScalarGridSpec(
            num_scalar_prefetch=0,
            grid=(n_pad // tk,),
            in_specs=[
                pl.BlockSpec((b_pad, tk), lambda k: (0, k)),        # (P @ A) tile
                pl.BlockSpec((b_pad, tk), lambda k: (0, k)),        # P tile
                pl.BlockSpec((tk, c_in), lambda k: (k, 0)),         # H rows
                pl.BlockSpec((2 * c_in, c_out), lambda k: (0, 0)),  # [Wl ; Wr]
                pl.BlockSpec((1, c_out), lambda k: (0, 0)),         # bias
            ],
            out_specs=pl.BlockSpec((b_pad, c_out), lambda k: (0, 0)),
            scratch_shapes=[pltpu.VMEM((b_pad, c_in), jnp.float32),
                            pltpu.VMEM((b_pad, c_in), jnp.float32)],
        ),
        compiler_params=pltpu.CompilerParams(
            dimension_semantics=("arbitrary",),
            vmem_limit_bytes=32 * 1024 * 1024,
        ),
    )(pa, p, h, w_cat, bias)


def gnn_encoder_sage(x, edge_index, batch, params, num_graphs):
    """x: (N, C_in) f32, edge_index: (2, E) i32, batch: (N,) i32 -> (num_graphs, C_out)."""
    N, c_in = x.shape
    (wl1, wr1, b1), (wl2, wr2, b2), (wl3, wr3, b3) = params
    c_hid = wl1.shape[1]
    c_out = wl3.shape[1]

    # lane-dense / tile-friendly padded sizes
    n_pad = max(_round_up(N, LANE), LANE)
    ci = _round_up(c_in, LANE)
    ch = _round_up(c_hid, LANE)
    co = _round_up(c_out, LANE)
    b_pad = max(_round_up(num_graphs, 8), 8)

    src, dst = edge_index[0], edge_index[1]

    # Dense row-normalized adjacency: A[i, j] = 1/deg_in(i) if edge j -> i (scatter-mean).
    adj = jnp.zeros((n_pad, n_pad), jnp.float32).at[dst, src].add(1.0)
    deg = adj.sum(axis=1, keepdims=True)
    adj = jnp.where(deg > 0, adj / jnp.maximum(deg, 1.0), 0.0)

    # global_mean_pool as a (B, N) matrix whose rows sum to 1.
    pool = jnp.zeros((b_pad, n_pad), jnp.float32).at[batch, jnp.arange(N)].set(1.0)
    cnt = pool.sum(axis=1, keepdims=True)
    pool = jnp.where(cnt > 0, pool / jnp.maximum(cnt, 1.0), 0.0)

    adj_bf = adj.astype(jnp.bfloat16)
    pool_bf = pool.astype(jnp.bfloat16)
    # Fold pooling into layer 3:  P @ (A @ h) == (P @ A) @ h.
    pa_bf = jnp.dot(pool, adj, preferred_element_type=jnp.float32).astype(jnp.bfloat16)

    x_pad = jnp.zeros((n_pad, ci), jnp.bfloat16).at[:N, :c_in].set(x.astype(jnp.bfloat16))

    def pack_w(wl, wr, ci_p, co_p):
        r, c = wl.shape
        z = jnp.zeros((ci_p, co_p), jnp.bfloat16)
        return jnp.concatenate([z.at[:r, :c].set(wl.astype(jnp.bfloat16)),
                                z.at[:r, :c].set(wr.astype(jnp.bfloat16))], axis=0)

    def pack_b(bias, co_p):
        return jnp.zeros((1, co_p), jnp.float32).at[:, :bias.shape[-1]].set(
            bias.astype(jnp.float32))

    w1, bb1 = pack_w(wl1, wr1, ci, ch), pack_b(b1, ch)
    w2, bb2 = pack_w(wl2, wr2, ch, ch), pack_b(b2, ch)
    w3, bb3 = pack_w(wl3, wr3, ch, co), pack_b(b3, co)

    tm = tk = _pick_tile(n_pad)

    h1 = _sage_layer(adj_bf, x_pad, w1, bb1, apply_relu=True, tm=tm, tk=tk)
    h2 = _sage_layer(adj_bf, h1, w2, bb2, apply_relu=True, tm=tm, tk=tk)
    out = _pooled_sage_layer(pa_bf, pool_bf, h2, w3, bb3, tk=tk)
    return out[:num_graphs, :c_out]


# --------------------------------------------------------------------------- reference / params

def init_sage_params(key, c_in, c_hidden, c_out):
    """Deterministic synthetic parameters. Weights stored as (C_in, C_out)."""
    ks = jax.random.split(key, 9)

    def w(k, ci, co):
        return jax.random.normal(k, (ci, co), jnp.float32) / jnp.sqrt(ci)

    p1 = (w(ks[0], c_in, c_hidden), w(ks[1], c_in, c_hidden),
          jax.random.normal(ks[2], (1, c_hidden), jnp.float32) * 0.01)
    p2 = (w(ks[3], c_hidden, c_hidden), w(ks[4], c_hidden, c_hidden),
          jax.random.normal(ks[5], (1, c_hidden), jnp.float32) * 0.01)
    p3 = (w(ks[6], c_hidden, c_out), w(ks[7], c_hidden, c_out),
          jax.random.normal(ks[8], (1, c_out), jnp.float32) * 0.01)
    return (p1, p2, p3)


def reference_forward(x, edge_index, batch, params, num_graphs):
    """Pure-JAX f32 reference of the PyTorch forward pass."""
    N = x.shape[0]
    src, dst = edge_index[0], edge_index[1]
    adj = jnp.zeros((N, N), jnp.float32).at[dst, src].add(1.0)
    deg = adj.sum(axis=1, keepdims=True)
    adj = jnp.where(deg > 0, adj / jnp.maximum(deg, 1.0), 0.0)
    pool = jnp.zeros((num_graphs, N), jnp.float32).at[batch, jnp.arange(N)].set(1.0)
    pool = pool / jnp.maximum(pool.sum(axis=1, keepdims=True), 1.0)

    def sage(h, wl, wr, b):
        return (adj @ h) @ wl + h @ wr + b

    (wl1, wr1, b1), (wl2, wr2, b2), (wl3, wr3, b3) = params
    h = jax.nn.relu(sage(x, wl1, wr1, b1))
    h = jax.nn.relu(sage(h, wl2, wr2, b2))
    h = sage(h, wl3, wr3, b3)
    return pool @ h


if __name__ == "__main__":
    key = jax.random.PRNGKey(0)
    k_feat, k_params = jax.random.split(key)

    # 2 graphs x 8 nodes, in_channels=6 (module spec), hidden=32, out=16.
    nodes_per_graph, num_graphs = 8, 2
    N = nodes_per_graph * num_graphs
    in_channels, hidden_channels, out_channels = 6, 32, 16

    x = jax.random.normal(k_feat, (N, in_channels), jnp.float32)
    batch = jnp.repeat(jnp.arange(num_graphs, dtype=jnp.int32), nodes_per_graph)

    # Bidirectional ring within each graph.
    src_list, dst_list = [], []
    for g in range(num_graphs):
        off = g * nodes_per_graph
        for i in range(nodes_per_graph):
            a, b = off + i, off + (i + 1) % nodes_per_graph
            src_list += [a, b]
            dst_list += [b, a]
    edge_index = jnp.array([src_list, dst_list], jnp.int32)

    params = init_sage_params(k_params, in_channels, hidden_channels, out_channels)

    out = gnn_encoder_sage(x, edge_index, batch, params, num_graphs)
    jax.block_until_ready(out)
    assert out.shape == (num_graphs, out_channels)

    ref = reference_forward(x, edge_index, batch, params, num_graphs)
    # bf16 matmul operands (f32 accumulation) -> loose tolerance vs f32 reference.
    assert bool(jnp.allclose(out, ref, atol=5e-2, rtol=5e-2)), \
        float(jnp.max(jnp.abs(out - ref)))
    print("KERNEL_OK")
</pallas_src>

<mosaic_0001>
module attributes {stable_mosaic.version = 11 : i64} {
  func.func @sage_layer_kernel(%arg0: i32, %arg1: i32, %arg2: memref<128x128xbf16, #tpu.memory_space<vmem>>, %arg3: memref<128x128xbf16, #tpu.memory_space<vmem>>, %arg4: memref<128x128xbf16, #tpu.memory_space<vmem>>, %arg5: memref<256x128xbf16, #tpu.memory_space<vmem>>, %arg6: memref<1x128xf32, #tpu.memory_space<vmem>>, %arg7: memref<128x128xbf16, #tpu.memory_space<vmem>>, %arg8: memref<128x128xf32, #tpu.memory_space<vmem>>) attributes {dimension_semantics = [#tpu.dimension_semantics<parallel>, #tpu.dimension_semantics<arbitrary>], iteration_bounds = array<i64: 1, 1>, scalar_prefetch = 0 : i64, scratch_operands = 1 : i64, tpu.core_type = #tpu.core_type<tc>, window_params = [{transform_indices = @transform_0, window_bounds = array<i64: 128, 128>}, {transform_indices = @transform_1, window_bounds = array<i64: 128, 128>}, {transform_indices = @transform_2, window_bounds = array<i64: 128, 128>}, {pipeline_mode = #tpu.pipeline_mode<synchronous>, transform_indices = @transform_3, window_bounds = array<i64: 256, 128>}, {pipeline_mode = #tpu.pipeline_mode<synchronous>, transform_indices = @transform_4, window_bounds = array<i64: 1, 128>}, {transform_indices = @transform_5, window_bounds = array<i64: 128, 128>}]} {
    %c0_i32 = arith.constant 0 : i32
    %0 = arith.cmpi eq, %arg1, %c0_i32 : i32
    %1 = arith.extui %0 : i1 to i32
    %c0_i32_0 = arith.constant 0 : i32
    %2 = arith.cmpi ne, %1, %c0_i32_0 : i32
    scf.if %2 {
      %cst_10 = arith.constant 0.000000e+00 : f32
      %12 = vector.broadcast %cst_10 : f32 to vector<128x128xf32>
      %c0_11 = arith.constant 0 : index
      %c0_12 = arith.constant 0 : index
      %13 = vector.load %arg8[%c0_11, %c0_12] : memref<128x128xf32, #tpu.memory_space<vmem>>, vector<128x128xf32>
      tpu.vector_store %arg8[%c0_11, %c0_12], %12 {strides = array<i32>} : memref<128x128xf32, #tpu.memory_space<vmem>>, vector<128x128xf32>,
    } else {
    }
    %c0 = arith.constant 0 : index
    %c0_1 = arith.constant 0 : index
    %3 = vector.load %arg8[%c0, %c0_1] : memref<128x128xf32, #tpu.memory_space<vmem>>, vector<128x128xf32>
    %c0_2 = arith.constant 0 : index
    %c0_3 = arith.constant 0 : index
    %4 = vector.load %arg2[%c0_2, %c0_3] : memref<128x128xbf16, #tpu.memory_space<vmem>>, vector<128x128xbf16>
    %c0_4 = arith.constant 0 : index
    %c0_5 = arith.constant 0 : index
    %5 = vector.load %arg3[%c0_4, %c0_5] : memref<128x128xbf16, #tpu.memory_space<vmem>>, vector<128x128xbf16>
    %cst = arith.constant dense<0.000000e+00> : vector<128x128xf32>
    %6 = tpu.matmul %4, %5, %cst {dimension_numbers = #tpu.dot_dimension_numbers<[1], [0], [0], [1], [0, 0, 1, 1], [], []>} : vector<128x128xbf16>, vector<128x128xbf16>, vector<128x128xf32> -> vector<128x128xf32>
    %7 = arith.addf %3, %6 : vector<128x128xf32>
    %c0_6 = arith.constant 0 : index
    %c0_7 = arith.constant 0 : index
    %8 = vector.load %arg8[%c0_6, %c0_7] : memref<128x128xf32, #tpu.memory_space<vmem>>, vector<128x128xf32>
    tpu.vector_store %arg8[%c0_6, %c0_7], %7 {strides = array<i32>} : memref<128x128xf32, #tpu.memory_space<vmem>>, vector<128x128xf32>,
    %c0_i32_8 = arith.constant 0 : i32
    %9 = arith.cmpi eq, %arg1, %c0_i32_8 : i32
    %10 = arith.extui %9 : i1 to i32
    %c0_i32_9 = arith.constant 0 : i32
    %11 = arith.cmpi ne, %10, %c0_i32_9 : i32
    scf.if %11 {
      %c0_10 = arith.constant 0 : index
      %c0_11 = arith.constant 0 : index
      %12 = vector.load %arg8[%c0_10, %c0_11] : memref<128x128xf32, #tpu.memory_space<vmem>>, vector<128x128xf32>
      %13 = arith.truncf %12 : vector<128x128xf32> to vector<128x128xbf16>
      %c0_12 = arith.constant 0 : index
      %c0_13 = arith.constant 0 : index
      %14 = vector.load %arg4[%c0_12, %c0_13] : memref<128x128xbf16, #tpu.memory_space<vmem>>, vector<128x128xbf16>
      %15 = tpu.concatenate %13, %14 in 1 : vector<128x128xbf16>, vector<128x128xbf16> -> vector<128x256xbf16>
      %c0_14 = arith.constant 0 : index
      %c0_15 = arith.constant 0 : index
      %16 = vector.load %arg5[%c0_14, %c0_15] : memref<256x128xbf16, #tpu.memory_space<vmem>>, vector<256x128xbf16>
      %cst_16 = arith.constant dense<0.000000e+00> : vector<128x128xf32>
      %17 = tpu.matmul %15, %16, %cst_16 {dimension_numbers = #tpu.dot_dimension_numbers<[1], [0], [0], [1], [0, 0, 1, 1], [], []>} : vector<128x256xbf16>, vector<256x128xbf16>, vector<128x128xf32> -> vector<128x128xf32>
      %c0_17 = arith.constant 0 : index
      %c0_18 = arith.constant 0 : index
      %18 = vector.load %arg6[%c0_17, %c0_18] : memref<1x128xf32, #tpu.memory_space<vmem>>, vector<1x128xf32>
      %19 = vector.broadcast %18 : vector<1x128xf32> to vector<128x128xf32>
      %20 = arith.addf %17, %19 : vector<128x128xf32>
      %cst_19 = arith.constant 0.000000e+00 : f32
      %21 = vector.broadcast %cst_19 : f32 to vector<128x128xf32>
      %22 = arith.maximumf %20, %21 : vector<128x128xf32>
      %23 = arith.truncf %22 : vector<128x128xf32> to vector<128x128xbf16>
      %c0_20 = arith.constant 0 : index
      %c0_21 = arith.constant 0 : index
      %24 = vector.load %arg7[%c0_20, %c0_21] : memref<128x128xbf16, #tpu.memory_space<vmem>>, vector<128x128xbf16>
      tpu.vector_store %arg7[%c0_20, %c0_21], %23 {strides = array<i32>} : memref<128x128xbf16, #tpu.memory_space<vmem>>, vector<128x128xbf16>,
    } else {
    }
    return
  }
  func.func @transform_0(%arg0: i32, %arg1: i32) -> (i32, i32) {
    %c0_i32 = arith.constant 0 : i32
    return %arg0, %arg1 : i32, i32
  }
  func.func @transform_1(%arg0: i32, %arg1: i32) -> (i32, i32) {
    %c0_i32 = arith.constant 0 : i32
    %c0_i32_0 = arith.constant 0 : i32
    return %arg1, %c0_i32 : i32, i32
  }
  func.func @transform_2(%arg0: i32, %arg1: i32) -> (i32, i32) {
    %c0_i32 = arith.constant 0 : i32
    %c0_i32_0 = arith.constant 0 : i32
    return %arg0, %c0_i32 : i32, i32
  }
  func.func @transform_3(%arg0: i32, %arg1: i32) -> (i32, i32) {
    %c0_i32 = arith.constant 0 : i32
    %c0_i32_0 = arith.constant 0 : i32
    %c0_i32_1 = arith.constant 0 : i32
    return %c0_i32, %c0_i32_0 : i32, i32
  }
  func.func @transform_4(%arg0: i32, %arg1: i32) -> (i32, i32) {
    %c0_i32 = arith.constant 0 : i32
    %c0_i32_0 = arith.constant 0 : i32
    %c0_i32_1 = arith.constant 0 : i32
    return %c0_i32, %c0_i32_0 : i32, i32
  }
  func.func @transform_5(%arg0: i32, %arg1: i32) -> (i32, i32) {
    %c0_i32 = arith.constant 0 : i32
    %c0_i32_0 = arith.constant 0 : i32
    return %arg0, %c0_i32 : i32, i32
  }
}

</mosaic_0001>

<bundles_post_ra>
// kernel: tpu_custom_call.1
= control target key start
LH: loop header
LB: loop body
LE: loop exit
PB: predicated region body
PF: predicated region fallthrough
CT: control target
= control target key end

     0   :  { %10 = vsyncpa [#allocation4], 0  ;;  %s1368_s0 = inlined_call_operand.hbm [shape: bf16[128,128], index: 0, kind: input, shape index: {}]   ;;  %s1369_s1 = inlined_call_operand.hbm [shape: bf16[128,128], index: 1, kind: input, shape index: {}]   ;;  %s1370_s2 = inlined_call_operand.hbm [shape: bf16[128,128], index: 2, kind: input, shape index: {}]   ;;  %s1371_s3 = inlined_call_operand.hbm [shape: bf16[256,128], index: 3, kind: input, shape index: {}]   ;;  %s1372_s4 = inlined_call_operand.vmem [shape: f32[1,128], index: 4, kind: input, shape index: {}]   ;;  %s1373_s5 = inlined_call_operand.hbm [shape: bf16[128,128], index: 5, kind: output, shape index: {}]  }
   0x1   :  { %11 = vsyncpa [#allocation7], 0 }
   0x2   :  { %12 = vsyncpa [#allocation10], 0 }
   0x3   :  { %13 = vsyncpa [#allocation5], 0  ;;  %s1221_s18 = smov [#allocation6]   ;;  %s1222_s20 = smov [#allocation3]  }
   0x4   :  { %s31_s19 = sshll.u32 %s1221_s18, 4  ;;  %s19_s21 = sshll.u32 %s1222_s20, 4  ;;  %s32_s19 = int_to_ptr.vmem [resolvable:$true] %s31_s19  ;;  %s1258_s21 = int_to_ptr.vmem [resolvable:$true] %s19_s21 }
   0x5   :  { %s1103_s24 = scalar_lea.hbm %s1369_s1, 1024 }
   0x6   :  { %p1104_p0 = scmp.ne.s32.totalorder %s1369_s1, %s1103_s24  ;;  %p1107_p1 = scmp.lt.u32.totalorder %s1103_s24, %s1369_s1 }
   0x8   :  { %p1109_p2 = pnand %p1107_p1, %p1104_p0 }
   0xa   :  { %1112 = shalt.err (!%p1109_p2)
}
   0xb   :  { %s1113_s29 = scalar_lea.vmem %s32_s19, 1024  ;;  %p1118_p4 = scmp.lt.s32.totalorder %s32_s19, %s32_s19 }
   0xc   :  { %p1114_p3 = scmp.ne.s32.totalorder %s32_s19, %s1113_s29  ;;  %p1119_p5 = scmp.lt.s32.totalorder %s1113_s29, %s1113_s29 }
   0xe   :  { %p1120_p6 = por %p1119_p5, %p1118_p4 }
  0x10   :  { %p1121_p7 = pnand %p1120_p6, %p1114_p3 }
  0x12   :  { %1124 = shalt.err (!%p1121_p7)
}
  0x13   :  { %s1223_s30 = smov 64   ;;  %s1224_s6 = smov 4  }
  0x14   :  { %37 = dma.hbm_to_vmem [thread:$0]  %s1369_s1, 1024, %s32_s19, [#allocation7], %s1223_s30, %s1223_s30, %s1224_s6  }
  0x15   :  { %s1125_s11 = scalar_lea.hbm %s1368_s0, 1024 }
  0x16   :  { %p1126_p8 = scmp.ne.s32.totalorder %s1368_s0, %s1125_s11  ;;  %p1129_p9 = scmp.lt.u32.totalorder %s1125_s11, %s1368_s0 }
  0x18   :  { %p1131_p10 = pnand %p1129_p9, %p1126_p8 }
  0x1a   :  { %1134 = shalt.err (!%p1131_p10)
}
  0x1b   :  { %s1135_s16 = scalar_lea.vmem %s1258_s21, 1024  ;;  %p1140_p12 = scmp.lt.s32.totalorder %s1258_s21, %s1258_s21 }
  0x1c   :  { %p1136_p11 = scmp.ne.s32.totalorder %s1258_s21, %s1135_s16  ;;  %p1141_p13 = scmp.lt.s32.totalorder %s1135_s16, %s1135_s16 }
  0x1e   :  { %p1142_p0 = por %p1141_p13, %p1140_p12 }
  0x20   :  { %p1143_p1 = pnand %p1142_p0, %p1136_p11 }
  0x22   :  { %1146 = shalt.err (!%p1143_p1)
}
  0x23   :  { %25 = dma.hbm_to_vmem [thread:$0]  %s1368_s0, 1024, %s1258_s21, [#allocation4], %s1223_s30, %s1223_s30, %s1224_s6  }
  0x24   :  { %s1225_s18 = smov [#allocation8]   ;;  %s1226_s20 = smov [#allocation9]  }
  0x25   :  { %s43_s19 = sshll.u32 %s1225_s18, 4  ;;  %s55_s22 = sshll.u32 %s1226_s20, 4  ;;  %s44_s19 = int_to_ptr.vmem [resolvable:$true] %s43_s19  ;;  %s1295_s22 = int_to_ptr.vmem [resolvable:$true] %s55_s22 }
  0x26   :  { %s1147_s25 = scalar_lea.hbm %s1370_s2, 1024 }
  0x27   :  { %p1148_p2 = scmp.ne.s32.totalorder %s1370_s2, %s1147_s25  ;;  %p1151_p3 = scmp.lt.u32.totalorder %s1147_s25, %s1370_s2 }
  0x29   :  { %p1153_p4 = pnand %p1151_p3, %p1148_p2 }
  0x2b   :  { %1156 = shalt.err (!%p1153_p4)
}
  0x2c   :  { %s1157_s0 = scalar_lea.vmem %s44_s19, 1024  ;;  %p1162_p6 = scmp.lt.s32.totalorder %s44_s19, %s44_s19 }
  0x2d   :  { %p1158_p5 = scmp.ne.s32.totalorder %s44_s19, %s1157_s0  ;;  %p1163_p7 = scmp.lt.s32.totalorder %s1157_s0, %s1157_s0 }
  0x2f   :  { %p1164_p8 = por %p1163_p7, %p1162_p6 }
  0x31   :  { %p1165_p9 = pnand %p1164_p8, %p1158_p5 }
  0x33   :  { %1168 = shalt.err (!%p1165_p9)
}
  0x34   :  { %49 = dma.hbm_to_vmem [thread:$0]  %s1370_s2, 1024, %s44_s19, [#allocation7], %s1223_s30, %s1223_s30, %s1224_s6  }
  0x35   :  { %s1169_s10 = scalar_lea.hbm %s1371_s3, 2048 }
  0x36   :  { %p1170_p10 = scmp.ne.s32.totalorder %s1371_s3, %s1169_s10  ;;  %p1173_p11 = scmp.lt.u32.totalorder %s1169_s10, %s1371_s3 }
  0x38   :  { %p1175_p12 = pnand %p1173_p11, %p1170_p10 }
  0x3a   :  { %1178 = shalt.err (!%p1175_p12)
}
  0x3b   :  { %s1179_s15 = scalar_lea.vmem %s1295_s22, 2048  ;;  %p1184_p0 = scmp.lt.s32.totalorder %s1295_s22, %s1295_s22 }
  0x3c   :  { %p1180_p13 = scmp.ne.s32.totalorder %s1295_s22, %s1179_s15  ;;  %p1185_p1 = scmp.lt.s32.totalorder %s1179_s15, %s1179_s15 }
  0x3e   :  { %p1186_p2 = por %p1185_p1, %p1184_p0 }
  0x40   :  { %p1187_p3 = pnand %p1186_p2, %p1180_p13 }
  0x42   :  { %1190 = shalt.err (!%p1187_p3)
}
  0x43   :  { %61 = dma.hbm_to_vmem [thread:$0]  %s1371_s3, 2048, %s1295_s22, [#allocation10], %s1223_s30, %s1223_s30, %s1224_s6  }
  0x44   :  { %1213 = dma.done.wait [#allocation4], 1024  }
  0x45   :  { %1214 = vsyncadd [#allocation4], 4294966272 }
  0x46   :  { %1215 = dma.done.wait [#allocation7], 2048  }
  0x47   :  { %1216 = vsyncadd [#allocation7], 4294965248 }
  0x48   :  { %1217 = dma.done.wait [#allocation10], 2048  }
  0x49   :  { %1218 = vsyncadd [#allocation10], 4294965248  ;;  %v1063_v0 = vld [vmem:[#allocation6] sm:$0xff]   ;;  %v1064_v1 = vld [vmem:[#allocation6 + $0x8] sm:$0xff]  }
  0x4a   :  { %1008 = vmatprep.subr.bf16.mxu0 %v1063_v0  ;;  %v1065_v2 = vld [vmem:[#allocation6 + $0x10] sm:$0xff]   ;;  %v1066_v3 = vld [vmem:[#allocation6 + $0x18] sm:$0xff]   ;;  %v1071_v4 = vld [vmem:[#allocation3] sm:$0xff]  }
  0x4b   :  { %1009 = vmatpush3.bf16.msra.mxu0 %v1063_v0  ;;  %1024 = vmatprep.mubr.bf16.mxu0 %v1071_v4  ;;  %v1067_v5 = vld [vmem:[#allocation6 + $0x20] sm:$0xff]   ;;  %v1068_v6 = vld [vmem:[#allocation6 + $0x28] sm:$0xff]   ;;  %v1069_v10 = vld [vmem:[#allocation6 + $0x30] sm:$0xff]  }
  0x4c   :  { %1010 = vmatprep.subr.bf16.mxu0 %v1064_v1  ;;  %v1079_v7 = vld [vmem:[#allocation9 + $0x40] sm:$0xff]   ;;  %v1081_v9 = vld [vmem:[#allocation9 + $0x48] sm:$0xff]   ;;  %v1083_v12 = vld [vmem:[#allocation9 + $0x50] sm:$0xff]  }
  0x4d   :  { %v1080_v8 = vld [vmem:[#allocation9] sm:$0xff]   ;;  %1040 = vmatprep.subr.bf16.mxu1 %v1079_v7  ;;  %v1082_v11 = vld [vmem:[#allocation9 + $0x8] sm:$0xff]   ;;  %v1070_v13 = vld [vmem:[#allocation6 + $0x38] sm:$0xff]  }
  0x4e   :  { %1048 = vmatpush3.bf16.msra.mxu1 %v1080_v8  ;;  %v1084_v14 = vld [vmem:[#allocation9 + $0x10] sm:$0xff]   ;;  %v1085_v15 = vld [vmem:[#allocation9 + $0x58] sm:$0xff]   ;;  %v1072_v16 = vld [vmem:[#allocation3 + $0x8] sm:$0xff]  }
  0x4f   :  { %1011 = vmatpush3.bf16.msra.mxu0 %v1064_v1  ;;  %1041 = vmatprep.subr.bf16.mxu1 %v1081_v9  ;;  %v1086_v17 = vld [vmem:[#allocation9 + $0x18] sm:$0xff]   ;;  %v1073_v18 = vld [vmem:[#allocation3 + $0x10] sm:$0xff]   ;;  %v1087_v19 = vld [vmem:[#allocation9 + $0x60] sm:$0xff]  }
  0x50   :  { %1012 = vmatprep.subr.bf16.mxu0 %v1065_v2  ;;  %v1088_v20 = vld [vmem:[#allocation9 + $0x20] sm:$0xff]   ;;  %v1089_v21 = vld [vmem:[#allocation9 + $0x68] sm:$0xff]   ;;  %v1074_v22 = vld [vmem:[#allocation3 + $0x18] sm:$0xff]  }
  0x51   :  { %v1090_v23 = vld [vmem:[#allocation9 + $0x28] sm:$0xff]   ;;  %v1075_v24 = vld [vmem:[#allocation3 + $0x20] sm:$0xff]   ;;  %v1091_v25 = vld [vmem:[#allocation9 + $0x70] sm:$0xff]  }
  0x52   :  { %1049 = vmatpush3.bf16.msra.mxu1 %v1082_v11  ;;  %v1092_v26 = vld [vmem:[#allocation9 + $0x30] sm:$0xff]   ;;  %v1076_v27 = vld [vmem:[#allocation3 + $0x28] sm:$0xff]   ;;  %v1078_v29 = vld [vmem:[#allocation3 + $0x38] sm:$0xff]  }
  0x53   :  { %1013 = vmatpush3.bf16.msra.mxu0 %v1065_v2  ;;  %1042 = vmatprep.subr.bf16.mxu1 %v1083_v12  ;;  %v1077_v28 = vld [vmem:[#allocation3 + $0x30] sm:$0xff]   ;;  %v1093_v30 = vld [vmem:[#allocation9 + $0x78] sm:$0xff]   ;;  %v1095_v32 = vld [vmem:[#allocation8] sm:$0xff]  }
  0x54   :  { %1014 = vmatprep.subr.bf16.mxu0 %v1066_v3  ;;  %v1094_v31 = vld [vmem:[#allocation9 + $0x38] sm:$0xff]   ;;  %v1097_v33 = vld [vmem:[#allocation8 + $0x10] sm:$0xff]   ;;  %v1096_v39 = vld [vmem:[#allocation8 + $0x8] sm:$0xff]  }
  0x55   :  { %644 = vmatprep.mubr.bf16.mxu1 %v1097_v33  ;;  %v1098_v46 = vld [vmem:[#allocation8 + $0x18] sm:$0xff]   ;;  %v1099_v53 = vld [vmem:[#allocation8 + $0x20] sm:$0xff]   ;;  %v1100_v58 = vld [vmem:[#allocation8 + $0x28] sm:$0xff]  }
  0x56   :  { %1050 = vmatpush3.bf16.msra.mxu1 %v1084_v14  ;;  %v1101_v62 = vld [vmem:[#allocation8 + $0x30] sm:$0xff]   ;;  %v1102_v63 = vld [vmem:[#allocation8 + $0x38] sm:$0xff]   ;;  %v1335_v1 = vld [vmem:[%s1372_s4] ss:$0 sm:$0xff]  ;;  %s1227_s4 = smov [#allocation11]  }
  0x57   :  { %1015 = vmatpush3.bf16.msra.mxu0 %v1066_v3  ;;  %1043 = vmatprep.subr.bf16.mxu1 %v1085_v15  ;;  %s794_s17 = sshll.u32 %s1227_s4, 4  ;;  %s795_s17 = int_to_ptr.vmem [resolvable:$true] %s794_s17 }
  0x58   :  { %1016 = vmatprep.subr.bf16.mxu0 %v1067_v5  ;;  %s1191_s18 = scalar_lea.vmem %s795_s17, 1024  ;;  %p1196_p5 = scmp.lt.s32.totalorder %s795_s17, %s795_s17 }
  0x59   :  { %p1192_p4 = scmp.ne.s32.totalorder %s795_s17, %s1191_s18  ;;  %p1197_p6 = scmp.lt.s32.totalorder %s1191_s18, %s1191_s18 }
  0x5a   :  { %1051 = vmatpush3.bf16.msra.mxu1 %v1086_v17 }
  0x5b   :  { %1017 = vmatpush3.bf16.msra.mxu0 %v1067_v5  ;;  %1044 = vmatprep.subr.bf16.mxu1 %v1087_v19  ;;  %p1198_p7 = por %p1197_p6, %p1196_p5 }
  0x5c   :  { %1018 = vmatprep.subr.bf16.mxu0 %v1068_v6 }
  0x5d   :  { %p1199_p8 = pnand %p1198_p7, %p1192_p4 }
  0x5e   :  { %1052 = vmatpush3.bf16.msra.mxu1 %v1088_v20 }
  0x5f   :  { %1019 = vmatpush3.bf16.msra.mxu0 %v1068_v6  ;;  %1045 = vmatprep.subr.bf16.mxu1 %v1089_v21 }
  0x60   :  { %1020 = vmatprep.subr.bf16.mxu0 %v1069_v10 }
  0x62   :  { %1053 = vmatpush3.bf16.msra.mxu1 %v1090_v23 }
  0x63   :  { %1021 = vmatpush3.bf16.msra.mxu0 %v1069_v10  ;;  %1046 = vmatprep.subr.bf16.mxu1 %v1091_v25 }
  0x64   :  { %1022 = vmatprep.subr.bf16.mxu0 %v1070_v13 }
  0x66   :  { %1054 = vmatpush3.bf16.msra.mxu1 %v1092_v26 }
  0x67   :  { %1023 = vmatpush3.bf16.msra.mxu0 %v1070_v13  ;;  %1047 = vmatprep.subr.bf16.mxu1 %v1093_v30 }
  0x68   :  { %944 = vmatprep.subr.bf16.mxu0 %v1079_v7 }
  0x6a   :  { %1025 = vmatmul.mubr.bf16.vlgmr.msra.gmra.mrb[0].mxu0 %v1072_v16  ;;  %1055 = vmatpush3.bf16.msra.mxu1 %v1094_v31 }
  0x6b   :  { %1028 = vmatprep.mubr.bf16.mxu0 %v1073_v18  ;;  %945 = vmatpush3.bf16.msra.mxu0 %v1080_v8 }
  0x6c   :  { %946 = vmatprep.subr.bf16.mxu0 %v1081_v9 }
  0x6f   :  { %947 = vmatpush3.bf16.msra.mxu0 %v1082_v11 }
  0x70   :  { %948 = vmatprep.subr.bf16.mxu0 %v1083_v12 }
  0x72   :  { %1029 = vmatmul.mubr.bf16.gmra.mrb[4].mxu0 %v1074_v22 }
  0x73   :  { %1032 = vmatprep.mubr.bf16.mxu0 %v1075_v24  ;;  %949 = vmatpush3.bf16.msra.mxu0 %v1084_v14 }
  0x74   :  { %950 = vmatprep.subr.bf16.mxu0 %v1085_v15 }
  0x77   :  { %951 = vmatpush3.bf16.msra.mxu0 %v1086_v17 }
  0x78   :  { %952 = vmatprep.subr.bf16.mxu0 %v1087_v19 }
  0x7a   :  { %1033 = vmatmul.mubr.bf16.gmra.mrb[8].mxu0 %v1076_v27 }
  0x7b   :  { %1036 = vmatprep.mubr.bf16.mxu0 %v1077_v28  ;;  %953 = vmatpush3.bf16.msra.mxu0 %v1088_v20 }
  0x7c   :  { %954 = vmatprep.subr.bf16.mxu0 %v1089_v21 }
  0x7f   :  { %955 = vmatpush3.bf16.msra.mxu0 %v1090_v23 }
  0x80   :  { %956 = vmatprep.subr.bf16.mxu0 %v1091_v25 }
  0x82   :  { %1037 = vmatmul.mubr.bf16.gmra.mrb[12].mxu0 %v1078_v29 }
  0x83   :  { %957 = vmatpush3.bf16.msra.mxu0 %v1092_v26  ;;  %628 = vmatprep.mubr.bf16.mxu0 %v1095_v32 }
  0x84   :  { %958 = vmatprep.subr.bf16.mxu0 %v1093_v30 }
  0x87   :  { %959 = vmatpush3.bf16.msra.mxu0 %v1094_v31 }
 0x13d   :  { %v1026_v34 = vpop.f32.mrb[0].mxu0 }
 0x13e   :  { %v275_v35 = vpop.f32.mrb[1].mxu0 }
 0x13f   :  { %v1027_v36 = vpop.f32.mrb[2].mxu0 }
 0x140   :  { %v390_v37 = vpack.c.bf16 %v1027_v36, %v1026_v34  ;;  %v278_v38 = vpop.f32.mrb[3].mxu0 }
 0x141   :  { %v389_v40 = vpack.c.bf16 %v278_v38, %v275_v35 }
 0x143   :  { %629 = vmatmul.mubr.bf16.vlgmr.msra.gmra.mrb[16].mxu0 %v389_v40 }
 0x144   :  { %636 = vmatprep.mubr.bf16.mxu0 %v1096_v39 }
 0x145   :  { %v1030_v41 = vpop.f32.mrb[4].mxu0 }
 0x146   :  { %v291_v42 = vpop.f32.mrb[5].mxu0 }
 0x147   :  { %v1031_v43 = vpop.f32.mrb[6].mxu0 }
 0x148   :  { %v392_v44 = vpack.c.bf16 %v1031_v43, %v1030_v41  ;;  %v294_v45 = vpop.f32.mrb[7].mxu0 }
 0x149   :  { %v391_v47 = vpack.c.bf16 %v294_v45, %v291_v42 }
 0x14b   :  { %637 = vmatmul.mubr.bf16.gmra.mrb[20].mxu0 %v390_v37  ;;  %645 = vmatmul.mubr.bf16.vlgmr.msra.gmra.mrb[0].mxu1 %v391_v47 }
 0x14c   :  { %652 = vmatprep.mubr.bf16.mxu1 %v1098_v46 }
 0x14d   :  { %v1034_v48 = vpop.f32.mrb[8].mxu0 }
 0x14e   :  { %v307_v49 = vpop.f32.mrb[9].mxu0 }
 0x14f   :  { %v1035_v50 = vpop.f32.mrb[10].mxu0 }
 0x150   :  { %v394_v51 = vpack.c.bf16 %v1035_v50, %v1034_v48  ;;  %v310_v52 = vpop.f32.mrb[11].mxu0 }
 0x151   :  { %v393_v54 = vpack.c.bf16 %v310_v52, %v307_v49 }
 0x153   :  { %653 = vmatmul.mubr.bf16.gmra.mrb[4].mxu1 %v392_v44 }
 0x154   :  { %660 = vmatprep.mubr.bf16.mxu1 %v1099_v53 }
 0x155   :  { %v1038_v55 = vpop.f32.mrb[12].mxu0 }
 0x156   :  { %v323_v56 = vpop.f32.mrb[13].mxu0 }
 0x157   :  { %v1039_v57 = vpop.f32.mrb[14].mxu0 }
 0x158   :  { %v396_v59 = vpack.c.bf16 %v1039_v57, %v1038_v55  ;;  %v326_v60 = vpop.f32.mrb[15].mxu0 }
 0x159   :  { %v395_v61 = vpack.c.bf16 %v326_v60, %v323_v56 }
 0x15b   :  { %661 = vmatmul.mubr.bf16.gmra.mrb[8].mxu1 %v393_v54 }
 0x15c   :  { %668 = vmatprep.mubr.bf16.mxu1 %v1100_v58 }
 0x163   :  { %669 = vmatmul.mubr.bf16.gmra.mrb[12].mxu1 %v394_v51 }
 0x164   :  { %676 = vmatprep.mubr.bf16.mxu1 %v1101_v62 }
 0x16b   :  { %677 = vmatmul.mubr.bf16.gmra.mrb[16].mxu1 %v395_v61 }
 0x16c   :  { %684 = vmatprep.mubr.bf16.mxu1 %v1102_v63 }
 0x173   :  { %685 = vmatmul.mubr.bf16.gmra.mrb[20].mxu1 %v396_v59 }
 0x216   :  { %v960_v0 = vpop.f32.mrb[16].mxu0 }
 0x217   :  { %v961_v2 = vpop.f32.mrb[17].mxu0 }
 0x218   :  { %v962_v3 = vadd.f32 %v961_v2, %v960_v0  ;;  %v963_v4 = vpop.f32.mrb[18].mxu0 }
 0x219   :  { %v964_v5 = vpop.f32.mrb[19].mxu0 }
 0x21a   :  { %v631_v6 = vadd.f32 %v962_v3, %v1335_v1  ;;  %v965_v7 = vadd.f32 %v964_v5, %v963_v4 }
 0x21c   :  { %v634_v8 = vadd.f32 %v965_v7, %v1335_v1  ;;  %v693_v9 = vmax.f32 %v631_v6, 0.0 }
 0x21e   :  { %v694_v10 = vmax.f32 %v634_v8, 0.0  ;;  %v966_v11 = vpop.f32.mrb[20].mxu0  ;;  %v972_v12 = vpop.f32.mrb[0].mxu1 }
 0x21f   :  { %v967_v13 = vpop.f32.mrb[21].mxu0  ;;  %v973_v14 = vpop.f32.mrb[1].mxu1 }
 0x220   :  { %v884_v15 = vpack.c.bf16 %v694_v10, %v693_v9  ;;  %v968_v16 = vadd.f32 %v967_v13, %v966_v11  ;;  %v974_v17 = vadd.f32 %v973_v14, %v972_v12  ;;  %v969_v18 = vpop.f32.mrb[22].mxu0  ;;  %v975_v19 = vpop.f32.mrb[2].mxu1 }
 0x221   :  { %v970_v20 = vpop.f32.mrb[23].mxu0  ;;  %v976_v21 = vpop.f32.mrb[3].mxu1 }
 0x222   :  { %885 = vst [vmem:[#allocation11] sm:$0xff] %v884_v15   ;;  %v639_v22 = vadd.f32 %v968_v16, %v1335_v1  ;;  %v647_v23 = vadd.f32 %v974_v17, %v1335_v1  ;;  %v971_v24 = vadd.f32 %v970_v20, %v969_v18  ;;  %v977_v25 = vadd.f32 %v976_v21, %v975_v19 }
 0x224   :  { %v642_v26 = vadd.f32 %v971_v24, %v1335_v1  ;;  %v650_v27 = vadd.f32 %v977_v25, %v1335_v1  ;;  %v695_v28 = vmax.f32 %v639_v22, 0.0  ;;  %v697_v29 = vmax.f32 %v647_v23, 0.0 }
 0x226   :  { %v696_v30 = vmax.f32 %v642_v26, 0.0  ;;  %v698_v31 = vmax.f32 %v650_v27, 0.0  ;;  %v978_v32 = vpop.f32.mrb[4].mxu1 }
 0x227   :  { %v979_v33 = vpop.f32.mrb[5].mxu1 }
 0x228   :  { %v889_v34 = vpack.c.bf16 %v696_v30, %v695_v28  ;;  %v894_v35 = vpack.c.bf16 %v698_v31, %v697_v29  ;;  %v980_v36 = vadd.f32 %v979_v33, %v978_v32  ;;  %v981_v37 = vpop.f32.mrb[6].mxu1 }
 0x229   :  { %v982_v38 = vpop.f32.mrb[7].mxu1 }
 0x22a   :  { %921 = vst [vmem:[#allocation11 + $0x8] sm:$0xff] %v889_v34   ;;  %922 = vst [vmem:[#allocation11 + $0x10] sm:$0xff] %v894_v35   ;;  %v655_v39 = vadd.f32 %v980_v36, %v1335_v1  ;;  %v983_v40 = vadd.f32 %v982_v38, %v981_v37 }
 0x22c   :  { %v658_v41 = vadd.f32 %v983_v40, %v1335_v1  ;;  %v699_v42 = vmax.f32 %v655_v39, 0.0 }
 0x22e   :  { %v700_v43 = vmax.f32 %v658_v41, 0.0  ;;  %v984_v44 = vpop.f32.mrb[8].mxu1 }
 0x22f   :  { %v985_v45 = vpop.f32.mrb[9].mxu1 }
 0x230   :  { %v899_v46 = vpack.c.bf16 %v700_v43, %v699_v42  ;;  %v986_v47 = vadd.f32 %v985_v45, %v984_v44  ;;  %v987_v48 = vpop.f32.mrb[10].mxu1 }
 0x231   :  { %v988_v49 = vpop.f32.mrb[11].mxu1 }
 0x232   :  { %923 = vst [vmem:[#allocation11 + $0x18] sm:$0xff] %v899_v46   ;;  %v663_v50 = vadd.f32 %v986_v47, %v1335_v1  ;;  %v989_v51 = vadd.f32 %v988_v49, %v987_v48 }
 0x234   :  { %v666_v52 = vadd.f32 %v989_v51, %v1335_v1  ;;  %v701_v53 = vmax.f32 %v663_v50, 0.0 }
 0x236   :  { %v702_v54 = vmax.f32 %v666_v52, 0.0  ;;  %v990_v55 = vpop.f32.mrb[12].mxu1 }
 0x237   :  { %v991_v56 = vpop.f32.mrb[13].mxu1 }
 0x238   :  { %v904_v57 = vpack.c.bf16 %v702_v54, %v701_v53  ;;  %v992_v58 = vadd.f32 %v991_v56, %v990_v55  ;;  %v993_v59 = vpop.f32.mrb[14].mxu1 }
 0x239   :  { %v994_v60 = vpop.f32.mrb[15].mxu1 }
 0x23a   :  { %924 = vst [vmem:[#allocation11 + $0x20] sm:$0xff] %v904_v57   ;;  %v671_v61 = vadd.f32 %v992_v58, %v1335_v1  ;;  %v995_v62 = vadd.f32 %v994_v60, %v993_v59 }
 0x23c   :  { %v674_v63 = vadd.f32 %v995_v62, %v1335_v1  ;;  %v703_v0 = vmax.f32 %v671_v61, 0.0 }
 0x23e   :  { %v704_v2 = vmax.f32 %v674_v63, 0.0  ;;  %v996_v3 = vpop.f32.mrb[16].mxu1 }
 0x23f   :  { %v997_v4 = vpop.f32.mrb[17].mxu1 }
 0x240   :  { %v909_v5 = vpack.c.bf16 %v704_v2, %v703_v0  ;;  %v998_v6 = vadd.f32 %v997_v4, %v996_v3  ;;  %v999_v7 = vpop.f32.mrb[18].mxu1 }
 0x241   :  { %v1000_v8 = vpop.f32.mrb[19].mxu1 }
 0x242   :  { %925 = vst [vmem:[#allocation11 + $0x28] sm:$0xff] %v909_v5   ;;  %v679_v9 = vadd.f32 %v998_v6, %v1335_v1  ;;  %v1001_v10 = vadd.f32 %v1000_v8, %v999_v7 }
 0x244   :  { %v682_v11 = vadd.f32 %v1001_v10, %v1335_v1  ;;  %v705_v12 = vmax.f32 %v679_v9, 0.0 }
 0x246   :  { %v706_v13 = vmax.f32 %v682_v11, 0.0  ;;  %v1002_v14 = vpop.f32.mrb[20].mxu1 }
 0x247   :  { %v1003_v15 = vpop.f32.mrb[21].mxu1 }
 0x248   :  { %v914_v16 = vpack.c.bf16 %v706_v13, %v705_v12  ;;  %v1004_v17 = vadd.f32 %v1003_v15, %v1002_v14  ;;  %v1005_v18 = vpop.f32.mrb[22].mxu1 }
 0x249   :  { %v1006_v19 = vpop.f32.mrb[23].mxu1 }
 0x24a   :  { %926 = vst [vmem:[#allocation11 + $0x30] sm:$0xff] %v914_v16   ;;  %v687_v20 = vadd.f32 %v1004_v17, %v1335_v1  ;;  %v1007_v21 = vadd.f32 %v1006_v19, %v1005_v18 }
 0x24c   :  { %v690_v22 = vadd.f32 %v1007_v21, %v1335_v1  ;;  %v707_v23 = vmax.f32 %v687_v20, 0.0 }
 0x24e   :  { %v708_v24 = vmax.f32 %v690_v22, 0.0 }
 0x250   :  { %v919_v25 = vpack.c.bf16 %v708_v24, %v707_v23 }
 0x252   :  { %927 = vst [vmem:[#allocation11 + $0x38] sm:$0xff] %v919_v25  }
 0x253   :  { %1202 = shalt.err (!%p1199_p8)
}
 0x254   :  { %s1203_s22 = scalar_lea.hbm %s1373_s5, 1024 }
 0x255   :  { %p1204_p9 = scmp.ne.s32.totalorder %s1373_s5, %s1203_s22  ;;  %p1207_p10 = scmp.lt.u32.totalorder %s1203_s22, %s1373_s5 }
 0x257   :  { %p1209_p11 = pnand %p1207_p10, %p1204_p9 }
 0x259   :  { %1212 = shalt.err (!%p1209_p11)
}
 0x25a   :  { %800 = dma.vmem_to_hbm [thread:$0]  %s795_s17, 1024, %s1373_s5, [#allocation5], %s1223_s30, %s1223_s30, %s1224_s6  }
 0x25b   :  { %1219 = dma.done.wait [#allocation5], 1024  }
 0x25c   :  { %1220 = vsyncadd [#allocation5], 4294966272 }
 0x25d   :  { %804 = vsyncpa [#allocation4], 1 }
 0x25e   :  { %805 = vsyncpa [#allocation7], 1 }
 0x25f   :  { %806 = vsyncpa [#allocation10], 1 }
 0x260   :  { %807 = vsyncpa [#allocation5], 1 }

</bundles_post_ra>
